<compile_context>
chip_gen: v7x
topology: tpu7x:2x2x1
jax: 0.10.0
libtpu: 0.0.40
codegen_flags: <defaults>
</compile_context>

<pallas_src>
import jax
import jax.numpy as jnp
from jax.experimental import pallas as pl
from jax.experimental.pallas import tpu as pltpu

FRAME_TIME = 0.1
BOOST_ACCEL_X = 0.18
BOOST_ACCEL_Y = 0.18
BOOST_ACCEL_Z = 0.18
BOOST_ACCEL_mX = -0.18
BOOST_ACCEL_mY = -0.18
GRAVITY_ACCEL = 0.12
DRAG = 0.02

# Scalar coefficients baked into the kernel as immediates (no constant operands DMA'd in).
_DT = FRAME_TIME
_DT_BX = FRAME_TIME * BOOST_ACCEL_X          # action[0] -> vx
_DT_BMX = FRAME_TIME * BOOST_ACCEL_mX        # action[1] -> vx
_DT_BY = FRAME_TIME * BOOST_ACCEL_Y          # action[2] -> vy
_DT_BMY = FRAME_TIME * BOOST_ACCEL_mY        # action[3] -> vy
_DT_BZ = FRAME_TIME * BOOST_ACCEL_Z          # action[4] -> vz (with -1 sign from delta_state_t)
_C_GRAV_DRAG = (GRAVITY_ACCEL - DRAG) * FRAME_TIME

_DEFAULT_TILE_N = 65536    # lanes per grid step; 17 f32 rows double-buffered ~= 8.9 MiB VMEM
_MAX_TILE_N = 262144       # hard cap (~35.6 MiB double-buffered) -- stays under v7x physical VMEM


def _pick_tile(n, max_tile):
    """Lane-aligned tile that never exceeds the batch (avoids padding blow-ups)."""
    if n <= 128:
        return n                         # block dim == full array dim (allowed by (8,128) rule)
    return min(max_tile, (n // 128) * 128)


def _compiler_params(tile):
    kwargs = dict(dimension_semantics=("parallel",))
    vmem_bytes = 2 * (6 + 5 + 6) * 4 * tile      # double-buffered in + out tiles (f32 upper bound)
    if vmem_bytes > (13 << 20):                  # beyond v5e's 16 MiB scoped-VMEM default
        kwargs["vmem_limit_bytes"] = int(min(vmem_bytes + (4 << 20), 48 << 20))
    return pltpu.CompilerParams(**kwargs)


def dynamics_kernel(state_ref, action_ref, out_ref):
    # Feature-major tiles: state (6, T), action (5, T), out (6, T); T sits on the lane axis.
    s = state_ref[...].astype(jnp.float32)
    a = action_ref[...].astype(jnp.float32)

    # Velocity updates (only rows 1, 3, 5 change): thrust + gravity + drag.
    v1 = s[1:2] + _DT_BX * a[0:1] + _DT_BMX * a[1:2]
    v3 = s[3:4] + _DT_BY * a[2:3] + _DT_BMY * a[3:4]
    v5 = s[5:6] - _DT_BZ * a[4:5] + _C_GRAV_DRAG

    od = out_ref.dtype
    # Euler step (step_mat): positions pick up dt * (already-updated) velocity.
    out_ref[0:1, :] = (s[0:1] + _DT * v1).astype(od)
    out_ref[1:2, :] = v1.astype(od)
    out_ref[2:3, :] = (s[2:3] + _DT * v3).astype(od)
    out_ref[3:4, :] = v3.astype(od)
    out_ref[4:5, :] = (s[4:5] + _DT * v5).astype(od)
    out_ref[5:6, :] = v5.astype(od)


def dynamics_tp_pallas(state_t, action_t, *, tile_n=_DEFAULT_TILE_N):
    """Optimized feature-major path: state_t (6, N), action_t (5, N) -> (6, N).

    No layout copies, no padding copies; ragged N handled by a partial final block.
    """
    state_t = jnp.asarray(state_t)
    action_t = jnp.asarray(action_t)
    if not jnp.issubdtype(state_t.dtype, jnp.floating):
        state_t = state_t.astype(jnp.float32)
    if not jnp.issubdtype(action_t.dtype, jnp.floating):
        action_t = action_t.astype(jnp.float32)

    assert state_t.shape[0] == 6 and action_t.shape[0] == 5
    n = state_t.shape[1]
    assert action_t.shape[1] == n and n > 0

    tile = _pick_tile(n, min(int(tile_n), _MAX_TILE_N))
    grid = (pl.cdiv(n, tile),)

    return pl.pallas_call(
        dynamics_kernel,
        out_shape=jax.ShapeDtypeStruct((6, n), state_t.dtype),
        grid=grid,
        in_specs=[pl.BlockSpec((6, tile), lambda i: (0, i)),
                  pl.BlockSpec((5, tile), lambda i: (0, i))],
        out_specs=pl.BlockSpec((6, tile), lambda i: (0, i)),
        compiler_params=_compiler_params(tile),
    )(state_t, action_t)


def dynamics_forward_pallas(state, action, *, tile_n=_DEFAULT_TILE_N):
    """Batch-first API matching the PyTorch module: state (N,6), action (N,5) -> (N,6).

    NOTE: the transposes below each cost an extra HBM pass; for large batches keep the
    data feature-major end-to-end and call dynamics_tp_pallas directly.
    """
    state = jnp.asarray(state, jnp.float32)
    action = jnp.asarray(action, jnp.float32)
    return dynamics_tp_pallas(state.T, action.T, tile_n=tile_n).T


def dynamics_reference(state, action):
    """Pure-JAX mirror of the PyTorch forward (dense matrix formulation)."""
    state = jnp.asarray(state, jnp.float32)
    action = jnp.asarray(action, jnp.float32)

    A = jnp.zeros((5, 6), dtype=jnp.float32)
    A = A.at[0, 1].set(FRAME_TIME * BOOST_ACCEL_X)
    A = A.at[1, 1].set(FRAME_TIME * BOOST_ACCEL_mX)
    A = A.at[2, 3].set(FRAME_TIME * BOOST_ACCEL_Y)
    A = A.at[3, 3].set(FRAME_TIME * BOOST_ACCEL_mY)
    A = A.at[4, 5].set(-FRAME_TIME * BOOST_ACCEL_Z)

    b = jnp.array([0.0, 0.0, 0.0, 0.0, 0.0,
                   GRAVITY_ACCEL * FRAME_TIME - DRAG * FRAME_TIME],
                  dtype=jnp.float32).reshape(1, 6)

    step_mat = jnp.array(
        [[1.0, FRAME_TIME, 0.0, 0.0, 0.0, 0.0],
         [0.0, 1.0,        0.0, 0.0, 0.0, 0.0],
         [0.0, 0.0,        1.0, FRAME_TIME, 0.0, 0.0],
         [0.0, 0.0,        0.0, 1.0,        0.0, 0.0],
         [0.0, 0.0,        0.0, 0.0,        1.0, FRAME_TIME],
         [0.0, 0.0,        0.0, 0.0,        0.0, 1.0]],
        dtype=jnp.float32)

    s = state + action @ A + b
    return s @ step_mat.T


if __name__ == "__main__":
    key = jax.random.PRNGKey(0)
    k1, k2 = jax.random.split(key)

    # Small, module-consistent shapes: batch of rocket states (N, 6) / actions (N, 5).
    N = 256
    state = jax.random.normal(k1, (N, 6), dtype=jnp.float32)
    action = jax.random.normal(k2, (N, 5), dtype=jnp.float32)
    ref = dynamics_reference(state, action)

    # Optimized feature-major path (no layout copies).
    out_t = dynamics_tp_pallas(state.T, action.T)
    jax.block_until_ready(out_t)
    assert out_t.shape == (6, N)
    assert jnp.allclose(out_t.T, ref, atol=1e-5, rtol=1e-5), "feature-major mismatch"

    # Module-compatible batch-first path.
    out = dynamics_forward_pallas(state, action)
    jax.block_until_ready(out)
    assert out.shape == (N, 6)
    assert jnp.allclose(out, ref, atol=1e-5, rtol=1e-5), "batch-first mismatch"

    # Ragged batch: exercises the partial final block (no pad copy, no wasted full tile).
    N2 = 200
    k3, k4 = jax.random.split(k2)
    state2 = jax.random.normal(k3, (N2, 6), dtype=jnp.float32)
    action2 = jax.random.normal(k4, (N2, 5), dtype=jnp.float32)
    out2 = dynamics_forward_pallas(state2, action2)
    jax.block_until_ready(out2)
    assert jnp.allclose(out2, dynamics_reference(state2, action2), atol=1e-5, rtol=1e-5), \
        "ragged-batch mismatch"

    print("KERNEL_OK")
</pallas_src>

<mosaic_0001>
module attributes {stable_mosaic.version = 11 : i64} {
  func.func @dynamics_kernel(%arg0: i32, %arg1: memref<6x256xf32, #tpu.memory_space<vmem>>, %arg2: memref<5x256xf32, #tpu.memory_space<vmem>>, %arg3: memref<6x256xf32, #tpu.memory_space<vmem>>) attributes {dimension_semantics = [#tpu.dimension_semantics<parallel>], iteration_bounds = array<i64: 1>, scalar_prefetch = 0 : i64, scratch_operands = 0 : i64, tpu.core_type = #tpu.core_type<tc>, window_params = [{transform_indices = @transform_0, window_bounds = array<i64: 6, 256>}, {transform_indices = @transform_1, window_bounds = array<i64: 5, 256>}, {transform_indices = @transform_2, window_bounds = array<i64: 6, 256>}]} {
    %c0 = arith.constant 0 : index
    %c0_0 = arith.constant 0 : index
    %0 = vector.load %arg1[%c0, %c0_0] : memref<6x256xf32, #tpu.memory_space<vmem>>, vector<6x256xf32>
    %c0_1 = arith.constant 0 : index
    %c0_2 = arith.constant 0 : index
    %1 = vector.load %arg2[%c0_1, %c0_2] : memref<5x256xf32, #tpu.memory_space<vmem>>, vector<5x256xf32>
    %2 = vector.extract_strided_slice %0 {offsets = [1, 0], sizes = [1, 256], strides = [1, 1]} : vector<6x256xf32> to vector<1x256xf32>
    %3 = vector.extract_strided_slice %1 {offsets = [0, 0], sizes = [1, 256], strides = [1, 1]} : vector<5x256xf32> to vector<1x256xf32>
    %cst = arith.constant 1.800000e-02 : f32
    %4 = vector.broadcast %cst : f32 to vector<1x256xf32>
    %5 = arith.mulf %4, %3 : vector<1x256xf32>
    %6 = arith.addf %2, %5 : vector<1x256xf32>
    %7 = vector.extract_strided_slice %1 {offsets = [1, 0], sizes = [1, 256], strides = [1, 1]} : vector<5x256xf32> to vector<1x256xf32>
    %cst_3 = arith.constant -1.800000e-02 : f32
    %8 = vector.broadcast %cst_3 : f32 to vector<1x256xf32>
    %9 = arith.mulf %8, %7 : vector<1x256xf32>
    %10 = arith.addf %6, %9 : vector<1x256xf32>
    %11 = vector.extract_strided_slice %0 {offsets = [3, 0], sizes = [1, 256], strides = [1, 1]} : vector<6x256xf32> to vector<1x256xf32>
    %12 = vector.extract_strided_slice %1 {offsets = [2, 0], sizes = [1, 256], strides = [1, 1]} : vector<5x256xf32> to vector<1x256xf32>
    %cst_4 = arith.constant 1.800000e-02 : f32
    %13 = vector.broadcast %cst_4 : f32 to vector<1x256xf32>
    %14 = arith.mulf %13, %12 : vector<1x256xf32>
    %15 = arith.addf %11, %14 : vector<1x256xf32>
    %16 = vector.extract_strided_slice %1 {offsets = [3, 0], sizes = [1, 256], strides = [1, 1]} : vector<5x256xf32> to vector<1x256xf32>
    %cst_5 = arith.constant -1.800000e-02 : f32
    %17 = vector.broadcast %cst_5 : f32 to vector<1x256xf32>
    %18 = arith.mulf %17, %16 : vector<1x256xf32>
    %19 = arith.addf %15, %18 : vector<1x256xf32>
    %20 = vector.extract_strided_slice %0 {offsets = [5, 0], sizes = [1, 256], strides = [1, 1]} : vector<6x256xf32> to vector<1x256xf32>
    %21 = vector.extract_strided_slice %1 {offsets = [4, 0], sizes = [1, 256], strides = [1, 1]} : vector<5x256xf32> to vector<1x256xf32>
    %cst_6 = arith.constant 1.800000e-02 : f32
    %22 = vector.broadcast %cst_6 : f32 to vector<1x256xf32>
    %23 = arith.mulf %22, %21 : vector<1x256xf32>
    %24 = arith.subf %20, %23 : vector<1x256xf32>
    %cst_7 = arith.constant 0.00999999977 : f32
    %25 = vector.broadcast %cst_7 : f32 to vector<1x256xf32>
    %26 = arith.addf %24, %25 : vector<1x256xf32>
    %27 = vector.extract_strided_slice %0 {offsets = [0, 0], sizes = [1, 256], strides = [1, 1]} : vector<6x256xf32> to vector<1x256xf32>
    %cst_8 = arith.constant 1.000000e-01 : f32
    %28 = vector.broadcast %cst_8 : f32 to vector<1x256xf32>
    %29 = arith.mulf %28, %10 : vector<1x256xf32>
    %30 = arith.addf %27, %29 : vector<1x256xf32>
    %c0_9 = arith.constant 0 : index
    %c0_10 = arith.constant 0 : index
    %31 = vector.load %arg3[%c0_9, %c0_10] : memref<6x256xf32, #tpu.memory_space<vmem>>, vector<1x256xf32>
    tpu.vector_store %arg3[%c0_9, %c0_10], %30 {strides = array<i32>} : memref<6x256xf32, #tpu.memory_space<vmem>>, vector<1x256xf32>,
    %c1 = arith.constant 1 : index
    %c0_11 = arith.constant 0 : index
    %32 = vector.load %arg3[%c1, %c0_11] : memref<6x256xf32, #tpu.memory_space<vmem>>, vector<1x256xf32>
    tpu.vector_store %arg3[%c1, %c0_11], %10 {strides = array<i32>} : memref<6x256xf32, #tpu.memory_space<vmem>>, vector<1x256xf32>,
    %33 = vector.extract_strided_slice %0 {offsets = [2, 0], sizes = [1, 256], strides = [1, 1]} : vector<6x256xf32> to vector<1x256xf32>
    %cst_12 = arith.constant 1.000000e-01 : f32
    %34 = vector.broadcast %cst_12 : f32 to vector<1x256xf32>
    %35 = arith.mulf %34, %19 : vector<1x256xf32>
    %36 = arith.addf %33, %35 : vector<1x256xf32>
    %c2 = arith.constant 2 : index
    %c0_13 = arith.constant 0 : index
    %37 = vector.load %arg3[%c2, %c0_13] : memref<6x256xf32, #tpu.memory_space<vmem>>, vector<1x256xf32>
    tpu.vector_store %arg3[%c2, %c0_13], %36 {strides = array<i32>} : memref<6x256xf32, #tpu.memory_space<vmem>>, vector<1x256xf32>,
    %c3 = arith.constant 3 : index
    %c0_14 = arith.constant 0 : index
    %38 = vector.load %arg3[%c3, %c0_14] : memref<6x256xf32, #tpu.memory_space<vmem>>, vector<1x256xf32>
    tpu.vector_store %arg3[%c3, %c0_14], %19 {strides = array<i32>} : memref<6x256xf32, #tpu.memory_space<vmem>>, vector<1x256xf32>,
    %39 = vector.extract_strided_slice %0 {offsets = [4, 0], sizes = [1, 256], strides = [1, 1]} : vector<6x256xf32> to vector<1x256xf32>
    %cst_15 = arith.constant 1.000000e-01 : f32
    %40 = vector.broadcast %cst_15 : f32 to vector<1x256xf32>
    %41 = arith.mulf %40, %26 : vector<1x256xf32>
    %42 = arith.addf %39, %41 : vector<1x256xf32>
    %c4 = arith.constant 4 : index
    %c0_16 = arith.constant 0 : index
    %43 = vector.load %arg3[%c4, %c0_16] : memref<6x256xf32, #tpu.memory_space<vmem>>, vector<1x256xf32>
    tpu.vector_store %arg3[%c4, %c0_16], %42 {strides = array<i32>} : memref<6x256xf32, #tpu.memory_space<vmem>>, vector<1x256xf32>,
    %c5 = arith.constant 5 : index
    %c0_17 = arith.constant 0 : index
    %44 = vector.load %arg3[%c5, %c0_17] : memref<6x256xf32, #tpu.memory_space<vmem>>, vector<1x256xf32>
    tpu.vector_store %arg3[%c5, %c0_17], %26 {strides = array<i32>} : memref<6x256xf32, #tpu.memory_space<vmem>>, vector<1x256xf32>,
    return
  }
  func.func @transform_0(%arg0: i32) -> (i32, i32) {
    %c0_i32 = arith.constant 0 : i32
    %c0_i32_0 = arith.constant 0 : i32
    return %c0_i32, %arg0 : i32, i32
  }
  func.func @transform_1(%arg0: i32) -> (i32, i32) {
    %c0_i32 = arith.constant 0 : i32
    %c0_i32_0 = arith.constant 0 : i32
    return %c0_i32, %arg0 : i32, i32
  }
  func.func @transform_2(%arg0: i32) -> (i32, i32) {
    %c0_i32 = arith.constant 0 : i32
    %c0_i32_0 = arith.constant 0 : i32
    return %c0_i32, %arg0 : i32, i32
  }
}

</mosaic_0001>

<bundles_post_ra>
// kernel: tpu_custom_call.1
= control target key start
LH: loop header
LB: loop body
LE: loop exit
PB: predicated region body
PF: predicated region fallthrough
CT: control target
= control target key end

     0   :  { %7 = vsyncpa [#allocation3], 0  ;;  %s340_s0 = inlined_call_operand.hbm [shape: f32[6,256], index: 0, kind: input, shape index: {}]   ;;  %s341_s1 = inlined_call_operand.hbm [shape: f32[5,256], index: 1, kind: input, shape index: {}]   ;;  %s342_s2 = inlined_call_operand.hbm [shape: f32[6,256], index: 2, kind: output, shape index: {}]  }
   0x1   :  { %8 = vsyncpa [#allocation6], 0 }
   0x2   :  { %9 = vsyncpa [#allocation4], 0  ;;  %s269_s9 = smov [#allocation2]   ;;  %s270_s11 = smov [#allocation5]  }
   0x3   :  { %s16_s10 = sshll.u32 %s269_s9, 4  ;;  %s26_s12 = sshll.u32 %s270_s11, 4  ;;  %s17_s10 = int_to_ptr.vmem [resolvable:$true] %s16_s10  ;;  %s27_s12 = int_to_ptr.vmem [resolvable:$true] %s26_s12 }
   0x4   :  { %s197_s15 = scalar_lea.hbm %s340_s0, 256 }
   0x5   :  { %p198_p0 = scmp.ne.s32.totalorder %s340_s0, %s197_s15  ;;  %p201_p1 = scmp.lt.u32.totalorder %s197_s15, %s340_s0 }
   0x7   :  { %p203_p2 = pnand %p201_p1, %p198_p0 }
   0x9   :  { %206 = shalt.err (!%p203_p2)
}
   0xa   :  { %s207_s20 = scalar_lea.vmem %s17_s10, 256  ;;  %p212_p4 = scmp.lt.s32.totalorder %s17_s10, %s17_s10 }
   0xb   :  { %p208_p3 = scmp.ne.s32.totalorder %s17_s10, %s207_s20  ;;  %p213_p5 = scmp.lt.s32.totalorder %s207_s20, %s207_s20 }
   0xd   :  { %p214_p6 = por %p213_p5, %p212_p4 }
   0xf   :  { %p215_p7 = pnand %p214_p6, %p208_p3 }
  0x11   :  { %218 = shalt.err (!%p215_p7)
}
  0x12   :  { %19 = dma.hbm_to_vmem [thread:$0]  %s340_s0, 256, %s17_s10, [#allocation3]  }
  0x13   :  { %s219_s25 = scalar_lea.hbm %s341_s1, 256 }
  0x14   :  { %p220_p8 = scmp.ne.s32.totalorder %s341_s1, %s219_s25  ;;  %p223_p9 = scmp.lt.u32.totalorder %s219_s25, %s341_s1 }
  0x16   :  { %p225_p10 = pnand %p223_p9, %p220_p8 }
  0x18   :  { %228 = shalt.err (!%p225_p10)
}
  0x19   :  { %s229_s30 = scalar_lea.vmem %s27_s12, 256  ;;  %p234_p12 = scmp.lt.s32.totalorder %s27_s12, %s27_s12 }
  0x1a   :  { %p230_p11 = scmp.ne.s32.totalorder %s27_s12, %s229_s30  ;;  %p235_p13 = scmp.lt.s32.totalorder %s229_s30, %s229_s30 }
  0x1c   :  { %p236_p0 = por %p235_p13, %p234_p12 }
  0x1e   :  { %p237_p1 = pnand %p236_p0, %p230_p11 }
  0x20   :  { %240 = shalt.err (!%p237_p1)
}
  0x21   :  { %29 = dma.hbm_to_vmem [thread:$0]  %s341_s1, 256, %s27_s12, [#allocation6]  }
  0x22   :  { %263 = dma.done.wait [#allocation3], 256  }
  0x23   :  { %264 = vsyncadd [#allocation3], 4294967040 }
  0x24   :  { %265 = dma.done.wait [#allocation6], 256  }
  0x25   :  { %266 = vsyncadd [#allocation6], 4294967040  ;;  %v38_v0 = vld [vmem:[#allocation5] sm:$0x1f]  ;;  %v271_v1 = vmov 1966171168   ;;  %v74_v3 = vlaneseq }
  0x26   :  { %v72_v2 = vunpack.c.l.s4 %v271_v1  ;;  %v39_v4 = vld [vmem:[#allocation5 + $0x8] sm:$0x1f]  ;;  %v40_v5 = vmul.f32 0.018, %v38_v0  ;;  %v36_v6 = vld [vmem:[#allocation2] sm:$0x3f] }
  0x27   :  { %v41_v7 = vmul.f32 0.018, %v39_v4  ;;  %v37_v8 = vld [vmem:[#allocation2 + $0x8] sm:$0x3f]  ;;  %v50_v10 = vmul.f32 -0.018, %v38_v0 }
  0x28   :  { %v44_v9 = vrot.slane %v40_v5, 7  ;;  %v51_v12 = vmul.f32 -0.018, %v39_v4  ;;  %v73_v13 = vunpack.c.0.s8 %v72_v2  ;;  %v75_v14 = vshrl.u32 %v74_v3, 7  ;;  %s272_s1 = smov [#allocation7]  }
  0x29   :  { %v45_v11 = vrot.slane %v41_v7, 7  ;;  %vm312_vm0 = vcmp.lt.s32.totalorder %v74_v3, 256  ;;  %s183_s4 = sshll.u32 %s272_s1, 4  ;;  %s184_s4 = int_to_ptr.vmem [resolvable:$true] %s183_s4 }
  0x2a   :  { %v48_v15 = vadd.f32 %v44_v9, %v36_v6  ;;  %v54_v16 = vsub.f32 %v36_v6, %v44_v9  ;;  %v76_v22 = vsub.s32 %v73_v13, %v75_v14  ;;  %s241_s5 = scalar_lea.vmem %s184_s4, 256  ;;  %p246_p3 = scmp.lt.s32.totalorder %s184_s4, %s184_s4 }
  0x2b   :  { %v49_v17 = vadd.f32 %v45_v11, %v37_v8  ;;  %v55_v18 = vsub.f32 %v37_v8, %v45_v11  ;;  %p242_p2 = scmp.ne.s32.totalorder %s184_s4, %s241_s5  ;;  %p247_p4 = scmp.lt.s32.totalorder %s241_s5, %s241_s5 }
  0x2c   :  { %v52_v19 = vadd.f32 %v50_v10, %v48_v15  ;;  %v56_v20 = vadd.f32 0.01, %v54_v16 }
  0x2d   :  { %v53_v21 = vadd.f32 %v51_v12, %v49_v17  ;;  %v57_v23 = vadd.f32 0.01, %v55_v18  ;;  %p248_p5 = por %p247_p4, %p246_p3 }
  0x2e   :  { %v58_v24 = vmul.f32 0.1, %v52_v19  ;;  %v124_v25 = vmul.f32 0.1, %v56_v20 }
  0x2f   :  { %v59_v26 = vmul.f32 0.1, %v53_v21  ;;  %v94_v27 = vcombine.low %v52_v19, %v53_v21  ;;  %v125_v28 = vmul.f32 0.1, %v57_v23  ;;  %v157_v29 = vcombine.high %v56_v20, %v57_v23  ;;  %p249_p6 = pnand %p248_p5, %p242_p2 }
  0x30   :  { %v62_v30 = vrot.slane %v58_v24, 1  ;;  %v128_v31 = vrot.slane %v124_v25, 1 }
  0x31   :  { %v63_v32 = vrot.slane %v59_v26, 1  ;;  %v101_v33 = vrot.slane %v94_v27, %v76_v22  ;;  %v129_v34 = vrot.slane %v125_v28, 1  ;;  %v164_v35 = vrot.slane %v157_v29, %v76_v22 }
  0x32   :  { %v66_v36 = vadd.f32 %v62_v30, %v36_v6  ;;  %v132_v37 = vadd.f32 %v128_v31, %v36_v6 }
  0x33   :  { %v67_v38 = vadd.f32 %v63_v32, %v37_v8  ;;  %v102_v39 = vcombine.high %v101_v33, %v101_v33  ;;  %v133_v40 = vadd.f32 %v129_v34, %v37_v8  ;;  %v165_v41 = vcombine.high %v164_v35, %v164_v35 }
  0x35   :  { %v70_v43 = vcombine.low %v66_v36, %v67_v38  ;;  %v109_v44 = vrot.slane %v102_v39, %v76_v22  ;;  %v136_v45 = vcombine.high %v132_v37, %v133_v40  ;;  %v172_v46 = vrot.slane %v165_v41, %v76_v22 }
  0x37   :  { %v77_v47 = vrot.slane %v70_v43, %v76_v22  ;;  %112 = vst.msk [vmem:[#allocation7 + $0x1] ss:$8 sm:$0x3] %vm312_vm0, %v109_v44  ;;  %v119_v48 = vcombine.high %v109_v44, %v109_v44  ;;  %v143_v49 = vrot.slane %v136_v45, %v76_v22  ;;  %175 = vst.msk [vmem:[#allocation7 + $0x5] ss:$8 sm:$0x3] %vm312_vm0, %v172_v46 }
  0x39   :  { %v84_v50 = vrot.slane %v77_v47, %v76_v22  ;;  %122 = vst.msk [vmem:[#allocation7 + $0x3] ss:$8 sm:$0x3] %vm312_vm0, %v119_v48  ;;  %v150_v51 = vrot.slane %v143_v49, %v76_v22 }
  0x3b   :  { %90 = vst.msk [vmem:[#allocation7] ss:$8 sm:$0x3] %vm312_vm0, %v84_v50  ;;  %v114_v52 = vcombine.high %v84_v50, %v84_v50  ;;  %153 = vst.msk [vmem:[#allocation7 + $0x4] ss:$8 sm:$0x3] %vm312_vm0, %v150_v51 }
  0x3d   :  { %117 = vst.msk [vmem:[#allocation7 + $0x2] ss:$8 sm:$0x3] %vm312_vm0, %v114_v52 }
  0x3e   :  { %252 = shalt.err (!%p249_p6)
}
  0x3f   :  { %s253_s8 = scalar_lea.hbm %s342_s2, 256 }
  0x40   :  { %p254_p7 = scmp.ne.s32.totalorder %s342_s2, %s253_s8  ;;  %p257_p8 = scmp.lt.u32.totalorder %s253_s8, %s342_s2 }
  0x42   :  { %p259_p9 = pnand %p257_p8, %p254_p7 }
  0x44   :  { %262 = shalt.err (!%p259_p9)
}
  0x45   :  { %186 = dma.vmem_to_hbm [thread:$0]  %s184_s4, 256, %s342_s2, [#allocation4]  }
  0x46   :  { %267 = dma.done.wait [#allocation4], 256  }
  0x47   :  { %268 = vsyncadd [#allocation4], 4294967040 }
  0x48   :  { %190 = vsyncpa [#allocation3], 1 }
  0x49   :  { %191 = vsyncpa [#allocation6], 1 }
  0x4a   :  { %192 = vsyncpa [#allocation4], 1 }

</bundles_post_ra>
